<compile_context>
chip_gen: v6e
topology: v6e:2x2x1
jax: 0.10.0
libtpu: 0.0.40
codegen_flags: <defaults>
</compile_context>

<pallas_src>
import jax
import jax.numpy as jnp
from jax.experimental import pallas as pl
from jax.experimental.pallas import tpu as pltpu


def relu_kernel(x_ref, y_ref, xo_ref, yo_ref):
    # Pure VPU elementwise max on lane-dense whole-array VMEM blocks.
    xo_ref[...] = jnp.maximum(x_ref[...], jnp.zeros((), x_ref.dtype))
    yo_ref[...] = jnp.maximum(y_ref[...], jnp.zeros((), y_ref.dtype))


def unbind_relu(x, y):
    """x: (3, H, W) — unbind dim 0; y: (B, 9, H, W) — unbind dim 1; ReLU each slice."""
    C, H, W = x.shape
    B, N, Hy, Wy = y.shape

    # Lane-dense, bitcast-only layouts (no transpose, no extra HBM round trip):
    #   x: (3, H*W)      trailing dim 256 = 2 * 128 lanes
    #   y: (B*9, Hy*Wy)  native memory order, trailing dim 256 = 2 * 128 lanes
    x2 = x.reshape(C, H * W)
    y2 = y.reshape(B * N, Hy * Wy)

    xr, yr = pl.pallas_call(
        relu_kernel,
        out_shape=(
            jax.ShapeDtypeStruct(x2.shape, x2.dtype),
            jax.ShapeDtypeStruct(y2.shape, y2.dtype),
        ),
        in_specs=[
            pl.BlockSpec(memory_space=pltpu.VMEM),
            pl.BlockSpec(memory_space=pltpu.VMEM),
        ],
        out_specs=(
            pl.BlockSpec(memory_space=pltpu.VMEM),
            pl.BlockSpec(memory_space=pltpu.VMEM),
        ),
    )(x2, y2)

    xr = xr.reshape(C, H, W)
    yr = yr.reshape(B, N, Hy, Wy)

    # torch.unbind(x, dim=0) -> 3 tensors of shape (H, W)
    x_slices = tuple(xr[i] for i in range(C))
    # torch.unbind(y, dim=1) -> 9 tensors of shape (B, Hy, Wy)
    y_slices = tuple(yr[:, j] for j in range(N))
    return x_slices + y_slices


if __name__ == "__main__":
    key = jax.random.PRNGKey(0)
    kx, ky = jax.random.split(key)

    # Shapes consistent with the forward: x has 3 along dim 0, y has 9 along dim 1.
    x = jax.random.normal(kx, (3, 16, 16), dtype=jnp.float32)
    y = jax.random.normal(ky, (2, 9, 16, 16), dtype=jnp.float32)

    fn = jax.jit(unbind_relu)
    outs = jax.block_until_ready(fn(x, y))

    # Sanity check vs pure-JAX reference (matches torch unbind + relu semantics).
    ref = tuple(jnp.maximum(x[i], 0.0) for i in range(3)) + tuple(
        jnp.maximum(y[:, j], 0.0) for j in range(9)
    )
    assert len(outs) == 12
    for o, r in zip(outs, ref):
        assert o.shape == r.shape and o.dtype == r.dtype
        assert jnp.allclose(o, r), "mismatch vs reference"

    print("KERNEL_OK")
</pallas_src>

<mosaic_0001>
module attributes {stable_mosaic.version = 11 : i64} {
  func.func @relu_kernel(%arg0: memref<3x256xf32, #tpu.memory_space<vmem>>, %arg1: memref<18x256xf32, #tpu.memory_space<vmem>>, %arg2: memref<3x256xf32, #tpu.memory_space<vmem>>, %arg3: memref<18x256xf32, #tpu.memory_space<vmem>>) attributes {dimension_semantics = [], scalar_prefetch = 0 : i64, scratch_operands = 0 : i64, tpu.core_type = #tpu.core_type<tc>} {
    %c0 = arith.constant 0 : index
    %c0_0 = arith.constant 0 : index
    %0 = vector.load %arg0[%c0, %c0_0] : memref<3x256xf32, #tpu.memory_space<vmem>>, vector<3x256xf32>
    %cst = arith.constant 0.000000e+00 : f32
    %1 = vector.broadcast %cst : f32 to vector<3x256xf32>
    %2 = arith.maximumf %0, %1 : vector<3x256xf32>
    %c0_1 = arith.constant 0 : index
    %c0_2 = arith.constant 0 : index
    %3 = vector.load %arg2[%c0_1, %c0_2] : memref<3x256xf32, #tpu.memory_space<vmem>>, vector<3x256xf32>
    tpu.vector_store %arg2[%c0_1, %c0_2], %2 {strides = array<i32>} : memref<3x256xf32, #tpu.memory_space<vmem>>, vector<3x256xf32>,
    %c0_3 = arith.constant 0 : index
    %c0_4 = arith.constant 0 : index
    %4 = vector.load %arg1[%c0_3, %c0_4] : memref<18x256xf32, #tpu.memory_space<vmem>>, vector<18x256xf32>
    %cst_5 = arith.constant 0.000000e+00 : f32
    %5 = vector.broadcast %cst_5 : f32 to vector<18x256xf32>
    %6 = arith.maximumf %4, %5 : vector<18x256xf32>
    %c0_6 = arith.constant 0 : index
    %c0_7 = arith.constant 0 : index
    %7 = vector.load %arg3[%c0_6, %c0_7] : memref<18x256xf32, #tpu.memory_space<vmem>>, vector<18x256xf32>
    tpu.vector_store %arg3[%c0_6, %c0_7], %6 {strides = array<i32>} : memref<18x256xf32, #tpu.memory_space<vmem>>, vector<18x256xf32>,
    return
  }
}

</mosaic_0001>

<bundles_post_ra>
// kernel: squeeze.12
= control target key start
LH: loop header
LB: loop body
LE: loop exit
PB: predicated region body
PF: predicated region fallthrough
CT: control target
= control target key end

     0   :  { %s125_s0 = inlined_call_operand.vmem [shape: f32[256], index: 0, kind: input, shape index: {}]   ;;  %s126_s1 = inlined_call_operand.hbm [shape: f32[16,16], index: 1, kind: output, shape index: {}]  }
   0x1   :  { %v6_v0 = vld [vmem:[%s125_s0] sm:$0x3] }
   0x2   :  { %7 = vst [vmem:[#allocation2] sm:$0x3] %v6_v0 }
   0x3   :  { %2 = vsyncpa [#allocation1], 0  ;;  %s93_s0 = smov 112   ;;  %s94_s8 = smov 80   ;;  %vm9_vm0 = vcmask 130048  }
   0x4   :  { %s95_s9 = smov 96   ;;  %s96_s10 = smov 64  }
   0x5   :  { %s97_s11 = smov 48   ;;  %s98_s12 = smov 32  }
   0x6   :  { %s99_s13 = smov 16   ;;  %s100_s14 = smov [#allocation0]  }
   0x7   :  { %s57_s15 = sshll.u32 %s100_s14, 4  ;;  %s58_s15 = int_to_ptr.vmem [resolvable:$true] %s57_s15 }
   0x8   :  { %s71_s16 = scalar_lea.vmem %s58_s15, 256  ;;  %p76_p1 = scmp.lt.s32.totalorder %s58_s15, %s58_s15 }
   0x9   :  { %v11_v1 = vld [vmem:[#allocation2] sm:$0x3]   ;;  %p72_p0 = scmp.ne.s32.totalorder %s58_s15, %s71_s16  ;;  %p77_p2 = scmp.lt.s32.totalorder %s71_s16, %s71_s16 }
   0xa   :  { %v23_v2 = vld [vmem:[#allocation2] sm:$0x3]   ;;  %12 = vrot.lane.b32.xlu0 %v11_v1, %s93_s0 }
   0xb   :  { %24 = vrot.lane.b32.xlu1 %v23_v2, %s94_s8  ;;  %v17_v3 = vld [vmem:[#allocation2] sm:$0x3]   ;;  %p78_p3 = por %p77_p2, %p76_p1 }
   0xc   :  { %v29_v4 = vld [vmem:[#allocation2] sm:$0x3]  }
   0xd   :  { %v8_v5 = vld [vmem:[#allocation2] sm:$0x3]   ;;  %p79_p4 = pnand %p78_p3, %p72_p0 }
   0xe   :  { %10 = vst.msk [vmem:[#allocation0] ss:$8 sm:$0x3] %vm9_vm0, %v8_v5   ;;  %18 = vrot.lane.b32.xlu0 %v17_v3, %s95_s9  ;;  %v35_v6 = vld [vmem:[#allocation2] sm:$0x3]  }
   0xf   :  { %30 = vrot.lane.b32.xlu1 %v29_v4, %s96_s10  ;;  %v41_v7 = vld [vmem:[#allocation2] sm:$0x3]  }
  0x10   :  { %v47_v8 = vld [vmem:[#allocation2] sm:$0x3]  }
  0x12   :  { %36 = vrot.lane.b32.xlu0 %v35_v6, %s97_s11 }
  0x13   :  { %42 = vrot.lane.b32.xlu1 %v41_v7, %s98_s12 }
  0x16   :  { %48 = vrot.lane.b32.xlu0 %v47_v8, %s99_s13 }
  0x7c   :  { %v13_v9 = vpop.permute.xlu0 %12  }
  0x7d   :  { %v25_v10 = vpop.permute.xlu1 %24   ;;  %16 = vst.msk [vmem:[#allocation0 + $0x1] ss:$8 sm:$0x3] %vm9_vm0, %v13_v9  }
  0x7e   :  { %28 = vst.msk [vmem:[#allocation0 + $0x3] ss:$8 sm:$0x3] %vm9_vm0, %v25_v10  }
  0x80   :  { %v19_v11 = vpop.permute.xlu0 %18  }
  0x81   :  { %v31_v12 = vpop.permute.xlu1 %30   ;;  %22 = vst.msk [vmem:[#allocation0 + $0x2] ss:$8 sm:$0x3] %vm9_vm0, %v19_v11  }
  0x82   :  { %34 = vst.msk [vmem:[#allocation0 + $0x4] ss:$8 sm:$0x3] %vm9_vm0, %v31_v12  }
  0x84   :  { %v37_v13 = vpop.permute.xlu0 %36  }
  0x85   :  { %v43_v14 = vpop.permute.xlu1 %42   ;;  %40 = vst.msk [vmem:[#allocation0 + $0x5] ss:$8 sm:$0x3] %vm9_vm0, %v37_v13  }
  0x86   :  { %46 = vst.msk [vmem:[#allocation0 + $0x6] ss:$8 sm:$0x3] %vm9_vm0, %v43_v14  }
  0x88   :  { %v49_v15 = vpop.permute.xlu0 %48  }
  0x89   :  { %52 = vst.msk [vmem:[#allocation0 + $0x7] ss:$8 sm:$0x3] %vm9_vm0, %v49_v15  }
  0x8a   :  { %82 = shalt.err (!%p79_p4)
}
  0x8b   :  { %60 = dma.vmem_to_hbm [thread:$0]  %s58_s15, 256, %s126_s1, [#allocation1]  }
  0x8c   :  { %91 = dma.done.wait [#allocation1], 256  }
  0x8d   :  { %92 = vsyncadd [#allocation1], 4294967040 }
  0x8e   :  { %62 = vsyncpa [#allocation1], 1 }

// kernel: unbind_relu.1
= control target key start
LH: loop header
LB: loop body
LE: loop exit
PB: predicated region body
PF: predicated region fallthrough
CT: control target
= control target key end

     0   :  { %s104_s0 = inlined_call_operand.vmem [shape: f32[3,256], index: 0, kind: input, shape index: {}]   ;;  %s105_s1 = inlined_call_operand.vmem [shape: f32[18,256], index: 1, kind: input, shape index: {}]   ;;  %s106_s2 = inlined_call_operand.vmem [shape: f32[3,256], index: 2, kind: output, shape index: {0}]   ;;  %s107_s3 = inlined_call_operand.vmem [shape: f32[18,256], index: 3, kind: output, shape index: {1}]  }
   0x1   :  { %v13_v0 = vld [vmem:[%s104_s0] sm:$0x77]  ;;  %v17_v2 = vld [vmem:[%s105_s1 + $0x8] sm:$0xff]  ;;  %v18_v6 = vld [vmem:[%s105_s1 + $0x10] sm:$0xff] }
   0x2   :  { %v16_v1 = vld [vmem:[%s105_s1] sm:$0xff]  ;;  %v14_v3 = vmax.f32 %v13_v0, 0.0  ;;  %v23_v5 = vmax.f32 %v17_v2, 0.0  ;;  %v19_v7 = vld [vmem:[%s105_s1 + $0x18] sm:$0xff]  ;;  %v24_v8 = vmax.f32 %v18_v6, 0.0 }
   0x3   :  { %v22_v4 = vmax.f32 %v16_v1, 0.0  ;;  %v25_v9 = vmax.f32 %v19_v7, 0.0  ;;  %v20_v10 = vld [vmem:[%s105_s1 + $0x20] sm:$0x3]  ;;  %v21_v11 = vld [vmem:[%s105_s1 + $0x28] sm:$0x3] }
   0x4   :  { %15 = vst [vmem:[%s106_s2] sm:$0x77] %v14_v3  ;;  %29 = vst [vmem:[%s107_s3 + $0x8] sm:$0xff] %v23_v5  ;;  %v26_v12 = vmax.f32 %v20_v10, 0.0  ;;  %v27_v13 = vmax.f32 %v21_v11, 0.0 }
   0x5   :  { %28 = vst [vmem:[%s107_s3] sm:$0xff] %v22_v4  ;;  %30 = vst [vmem:[%s107_s3 + $0x10] sm:$0xff] %v24_v8 }
   0x6   :  { %31 = vst [vmem:[%s107_s3 + $0x18] sm:$0xff] %v25_v9  ;;  %32 = vst [vmem:[%s107_s3 + $0x20] sm:$0x3] %v26_v12 }
   0x7   :  { %33 = vst [vmem:[%s107_s3 + $0x28] sm:$0x3] %v27_v13 }

</bundles_post_ra>
